<compile_context>
chip_gen: v7x
topology: tpu7x:2x2x1
jax: 0.10.0
libtpu: 0.0.40
codegen_flags: <defaults>
</compile_context>

<pallas_src>
import jax
import jax.numpy as jnp
from jax.experimental import pallas as pl
from jax.experimental.pallas import tpu as pltpu


def decoder_kernel(z_ref, w1_ref, b1_ref, w2_ref, b2_ref,
                   wout_ref, bout_ref, out_ref):
    # fc1 + ReLU  (bf16 matmul, f32 accumulate / epilogue)
    h2 = jnp.dot(z_ref[...], w1_ref[...],
                 preferred_element_type=jnp.float32) + b1_ref[...]
    h2 = jnp.maximum(h2, 0.0)
    # fc2 + ReLU
    h = jnp.dot(h2.astype(w2_ref.dtype), w2_ref[...],
                preferred_element_type=jnp.float32) + b2_ref[...]
    h = jnp.maximum(h, 0.0)
    # fused fc21 || fc22 -> [tm, 2*Md]; exp only on the scale half.
    out = jnp.dot(h.astype(wout_ref.dtype), wout_ref[...],
                  preferred_element_type=jnp.float32) + bout_ref[...]
    md = out_ref.shape[-1] // 2
    col = jax.lax.broadcasted_iota(jnp.int32, out.shape, 1)
    # exp runs on the EUP slot (free alongside VPU); select keeps loc half raw.
    out_ref[...] = jnp.where(col < md, out, jnp.exp(out)).astype(out_ref.dtype)


def decoder_forward(z, params, *, tm=128):
    """z: [B, z_dim] float32.  params: bf16 weights [in,out] (fc21/fc22 fused
    into w_out/b_out), f32 biases [1,out].  Returns (loc_y, scale_y) f32."""
    B, z_dim = z.shape
    md2 = params["w_out"].shape[1]        # 2 * Md
    md = md2 // 2
    tm = min(tm, B)
    assert tm % 8 == 0 and B % tm == 0, "batch tile must be a multiple of 8 dividing B"
    grid = (B // tm,)

    # Halve the z DMA bytes; matmul inputs are bf16, accumulation stays f32.
    z_in = z.astype(params["w1"].dtype)

    def batch_spec(feat):
        return pl.BlockSpec((tm, feat), lambda i: (i, 0))

    def pinned(arr):
        return pl.BlockSpec(arr.shape, lambda i: (0, 0))

    h2_dim = params["w1"].shape[1]
    h_dim = params["w2"].shape[1]
    flops = 2 * B * (z_dim * h2_dim + h2_dim * h_dim + h_dim * md2)
    bytes_accessed = (z_in.size * z_in.dtype.itemsize
                      + sum(v.size * v.dtype.itemsize for v in params.values())
                      + B * md2 * 4)

    out = pl.pallas_call(
        decoder_kernel,
        out_shape=jax.ShapeDtypeStruct((B, md2), jnp.float32),
        grid_spec=pltpu.PrefetchScalarGridSpec(
            num_scalar_prefetch=0,
            grid=grid,
            in_specs=[
                batch_spec(z_dim),
                pinned(params["w1"]), pinned(params["b1"]),
                pinned(params["w2"]), pinned(params["b2"]),
                pinned(params["w_out"]), pinned(params["b_out"]),
            ],
            out_specs=pl.BlockSpec((tm, md2), lambda i: (i, 0)),
        ),
        compiler_params=pltpu.CompilerParams(
            dimension_semantics=("parallel",),     # shard batch tiles across TCs on v7x
            vmem_limit_bytes=32 * 1024 * 1024,     # explicit; safe on v5e/v6e/v7x
        ),
        cost_estimate=pl.CostEstimate(
            flops=flops, transcendentals=B * md2, bytes_accessed=bytes_accessed),
    )(z_in, params["w1"], params["b1"], params["w2"], params["b2"],
      params["w_out"], params["b_out"])

    # Lane-dense single slab in the kernel; split here (cheap XLA slice).
    return out[:, :md], out[:, md:]


def init_params(key, z_dim, hidden_dim, hidden_dim2, Md, w_dtype=jnp.bfloat16):
    """Weights stored [in, out] (transposed vs PyTorch's [out, in]) in bf16;
    biases [1, out] in f32.  fc21/fc22 packed into a single [hidden, 2*Md]."""
    ks = jax.random.split(key, 8)

    def lin(kw, kb, fan_in, fan_out):
        bound = 1.0 / jnp.sqrt(fan_in)
        w = jax.random.uniform(kw, (fan_in, fan_out), jnp.float32, -bound, bound)
        b = jax.random.uniform(kb, (1, fan_out), jnp.float32, -bound, bound)
        return w, b

    w1, b1 = lin(ks[0], ks[1], z_dim, hidden_dim2)
    w2, b2 = lin(ks[2], ks[3], hidden_dim2, hidden_dim)
    w21, b21 = lin(ks[4], ks[5], hidden_dim, Md)
    w22, b22 = lin(ks[6], ks[7], hidden_dim, Md)
    w_out = jnp.concatenate([w21, w22], axis=1)   # [hidden, 2*Md]
    b_out = jnp.concatenate([b21, b22], axis=1)   # [1, 2*Md]
    return {"w1": w1.astype(w_dtype), "b1": b1,
            "w2": w2.astype(w_dtype), "b2": b2,
            "w_out": w_out.astype(w_dtype), "b_out": b_out}


def decoder_ref(z, p):
    """Pure-JAX reference mirroring the kernel's dtype path (bf16 weights,
    f32 accumulation) and the PyTorch forward semantics."""
    md = p["w_out"].shape[1] // 2
    zb = z.astype(p["w1"].dtype)
    h2 = jnp.maximum(jnp.dot(zb, p["w1"],
                             preferred_element_type=jnp.float32) + p["b1"], 0.0)
    h = jnp.maximum(jnp.dot(h2.astype(p["w2"].dtype), p["w2"],
                            preferred_element_type=jnp.float32) + p["b2"], 0.0)
    out = jnp.dot(h.astype(p["w_out"].dtype), p["w_out"],
                  preferred_element_type=jnp.float32) + p["b_out"]
    return out[:, :md], jnp.exp(out[:, md:])


if __name__ == "__main__":
    # Shapes consistent with the module: z_dim=16, hidden_dim=32, hidden_dim2=32,
    # Md=16.  Batch 256 with a 128-row tile gives a real 2-step parallel grid.
    B, z_dim, hidden_dim, hidden_dim2, Md = 256, 16, 32, 32, 16

    key = jax.random.PRNGKey(0)
    k_z, k_p = jax.random.split(key)
    z = jax.random.normal(k_z, (B, z_dim), jnp.float32)
    params = init_params(k_p, z_dim, hidden_dim, hidden_dim2, Md)

    loc_y, scale_y = decoder_forward(z, params, tm=128)
    jax.block_until_ready((loc_y, scale_y))

    # Correctness check against the pure-JAX reference (same bf16 weight path).
    loc_r, scale_r = decoder_ref(z, params)
    assert loc_y.shape == (B, Md) and scale_y.shape == (B, Md)
    assert jnp.allclose(loc_y, loc_r, atol=1e-2, rtol=1e-2)
    assert jnp.allclose(scale_y, scale_r, atol=1e-2, rtol=1e-2)

    print("KERNEL_OK")
</pallas_src>

<mosaic_0001>
module attributes {stable_mosaic.version = 11 : i64} {
  func.func @decoder_kernel(%arg0: i32, %arg1: memref<128x16xbf16, #tpu.memory_space<vmem>>, %arg2: memref<16x32xbf16, #tpu.memory_space<vmem>>, %arg3: memref<1x32xf32, #tpu.memory_space<vmem>>, %arg4: memref<32x32xbf16, #tpu.memory_space<vmem>>, %arg5: memref<1x32xf32, #tpu.memory_space<vmem>>, %arg6: memref<32x32xbf16, #tpu.memory_space<vmem>>, %arg7: memref<1x32xf32, #tpu.memory_space<vmem>>, %arg8: memref<128x32xf32, #tpu.memory_space<vmem>>) attributes {dimension_semantics = [#tpu.dimension_semantics<parallel>], iteration_bounds = array<i64: 2>, scalar_prefetch = 0 : i64, scratch_operands = 0 : i64, tpu.core_type = #tpu.core_type<tc>, window_params = [{transform_indices = @transform_0, window_bounds = array<i64: 128, 16>}, {pipeline_mode = #tpu.pipeline_mode<synchronous>, transform_indices = @transform_1, window_bounds = array<i64: 16, 32>}, {pipeline_mode = #tpu.pipeline_mode<synchronous>, transform_indices = @transform_2, window_bounds = array<i64: 1, 32>}, {pipeline_mode = #tpu.pipeline_mode<synchronous>, transform_indices = @transform_3, window_bounds = array<i64: 32, 32>}, {pipeline_mode = #tpu.pipeline_mode<synchronous>, transform_indices = @transform_4, window_bounds = array<i64: 1, 32>}, {pipeline_mode = #tpu.pipeline_mode<synchronous>, transform_indices = @transform_5, window_bounds = array<i64: 32, 32>}, {pipeline_mode = #tpu.pipeline_mode<synchronous>, transform_indices = @transform_6, window_bounds = array<i64: 1, 32>}, {transform_indices = @transform_7, window_bounds = array<i64: 128, 32>}]} {
    %c0 = arith.constant 0 : index
    %c0_0 = arith.constant 0 : index
    %0 = vector.load %arg1[%c0, %c0_0] : memref<128x16xbf16, #tpu.memory_space<vmem>>, vector<128x16xbf16>
    %c0_1 = arith.constant 0 : index
    %c0_2 = arith.constant 0 : index
    %1 = vector.load %arg2[%c0_1, %c0_2] : memref<16x32xbf16, #tpu.memory_space<vmem>>, vector<16x32xbf16>
    %cst = arith.constant dense<0.000000e+00> : vector<128x32xf32>
    %2 = tpu.matmul %0, %1, %cst {dimension_numbers = #tpu.dot_dimension_numbers<[1], [0], [0], [1], [0, 0, 1, 1], [], []>} : vector<128x16xbf16>, vector<16x32xbf16>, vector<128x32xf32> -> vector<128x32xf32>
    %c0_3 = arith.constant 0 : index
    %c0_4 = arith.constant 0 : index
    %3 = vector.load %arg3[%c0_3, %c0_4] : memref<1x32xf32, #tpu.memory_space<vmem>>, vector<1x32xf32>
    %4 = vector.broadcast %3 : vector<1x32xf32> to vector<128x32xf32>
    %5 = arith.addf %2, %4 : vector<128x32xf32>
    %cst_5 = arith.constant 0.000000e+00 : f32
    %6 = vector.broadcast %cst_5 : f32 to vector<128x32xf32>
    %7 = arith.maximumf %5, %6 : vector<128x32xf32>
    %8 = arith.truncf %7 : vector<128x32xf32> to vector<128x32xbf16>
    %c0_6 = arith.constant 0 : index
    %c0_7 = arith.constant 0 : index
    %9 = vector.load %arg4[%c0_6, %c0_7] : memref<32x32xbf16, #tpu.memory_space<vmem>>, vector<32x32xbf16>
    %cst_8 = arith.constant dense<0.000000e+00> : vector<128x32xf32>
    %10 = tpu.matmul %8, %9, %cst_8 {dimension_numbers = #tpu.dot_dimension_numbers<[1], [0], [0], [1], [0, 0, 1, 1], [], []>} : vector<128x32xbf16>, vector<32x32xbf16>, vector<128x32xf32> -> vector<128x32xf32>
    %c0_9 = arith.constant 0 : index
    %c0_10 = arith.constant 0 : index
    %11 = vector.load %arg5[%c0_9, %c0_10] : memref<1x32xf32, #tpu.memory_space<vmem>>, vector<1x32xf32>
    %12 = vector.broadcast %11 : vector<1x32xf32> to vector<128x32xf32>
    %13 = arith.addf %10, %12 : vector<128x32xf32>
    %cst_11 = arith.constant 0.000000e+00 : f32
    %14 = vector.broadcast %cst_11 : f32 to vector<128x32xf32>
    %15 = arith.maximumf %13, %14 : vector<128x32xf32>
    %16 = arith.truncf %15 : vector<128x32xf32> to vector<128x32xbf16>
    %c0_12 = arith.constant 0 : index
    %c0_13 = arith.constant 0 : index
    %17 = vector.load %arg6[%c0_12, %c0_13] : memref<32x32xbf16, #tpu.memory_space<vmem>>, vector<32x32xbf16>
    %cst_14 = arith.constant dense<0.000000e+00> : vector<128x32xf32>
    %18 = tpu.matmul %16, %17, %cst_14 {dimension_numbers = #tpu.dot_dimension_numbers<[1], [0], [0], [1], [0, 0, 1, 1], [], []>} : vector<128x32xbf16>, vector<32x32xbf16>, vector<128x32xf32> -> vector<128x32xf32>
    %c0_15 = arith.constant 0 : index
    %c0_16 = arith.constant 0 : index
    %19 = vector.load %arg7[%c0_15, %c0_16] : memref<1x32xf32, #tpu.memory_space<vmem>>, vector<1x32xf32>
    %20 = vector.broadcast %19 : vector<1x32xf32> to vector<128x32xf32>
    %21 = arith.addf %18, %20 : vector<128x32xf32>
    %22 = tpu.iota {dimensions = array<i32: 1>} : vector<128x32xi32>
    %c16_i32 = arith.constant 16 : i32
    %23 = vector.broadcast %c16_i32 : i32 to vector<128x32xi32>
    %24 = arith.cmpi slt, %22, %23 : vector<128x32xi32>
    %25 = math.exp %21 : vector<128x32xf32>
    %26 = arith.select %24, %21, %25 : vector<128x32xi1>, vector<128x32xf32>
    %c0_17 = arith.constant 0 : index
    %c0_18 = arith.constant 0 : index
    %27 = vector.load %arg8[%c0_17, %c0_18] : memref<128x32xf32, #tpu.memory_space<vmem>>, vector<128x32xf32>
    tpu.vector_store %arg8[%c0_17, %c0_18], %26 {strides = array<i32>} : memref<128x32xf32, #tpu.memory_space<vmem>>, vector<128x32xf32>,
    return
  }
  func.func @transform_0(%arg0: i32) -> (i32, i32) {
    %c0_i32 = arith.constant 0 : i32
    %c0_i32_0 = arith.constant 0 : i32
    return %arg0, %c0_i32 : i32, i32
  }
  func.func @transform_1(%arg0: i32) -> (i32, i32) {
    %c0_i32 = arith.constant 0 : i32
    %c0_i32_0 = arith.constant 0 : i32
    %c0_i32_1 = arith.constant 0 : i32
    return %c0_i32, %c0_i32_0 : i32, i32
  }
  func.func @transform_2(%arg0: i32) -> (i32, i32) {
    %c0_i32 = arith.constant 0 : i32
    %c0_i32_0 = arith.constant 0 : i32
    %c0_i32_1 = arith.constant 0 : i32
    return %c0_i32, %c0_i32_0 : i32, i32
  }
  func.func @transform_3(%arg0: i32) -> (i32, i32) {
    %c0_i32 = arith.constant 0 : i32
    %c0_i32_0 = arith.constant 0 : i32
    %c0_i32_1 = arith.constant 0 : i32
    return %c0_i32, %c0_i32_0 : i32, i32
  }
  func.func @transform_4(%arg0: i32) -> (i32, i32) {
    %c0_i32 = arith.constant 0 : i32
    %c0_i32_0 = arith.constant 0 : i32
    %c0_i32_1 = arith.constant 0 : i32
    return %c0_i32, %c0_i32_0 : i32, i32
  }
  func.func @transform_5(%arg0: i32) -> (i32, i32) {
    %c0_i32 = arith.constant 0 : i32
    %c0_i32_0 = arith.constant 0 : i32
    %c0_i32_1 = arith.constant 0 : i32
    return %c0_i32, %c0_i32_0 : i32, i32
  }
  func.func @transform_6(%arg0: i32) -> (i32, i32) {
    %c0_i32 = arith.constant 0 : i32
    %c0_i32_0 = arith.constant 0 : i32
    %c0_i32_1 = arith.constant 0 : i32
    return %c0_i32, %c0_i32_0 : i32, i32
  }
  func.func @transform_7(%arg0: i32) -> (i32, i32) {
    %c0_i32 = arith.constant 0 : i32
    %c0_i32_0 = arith.constant 0 : i32
    return %arg0, %c0_i32 : i32, i32
  }
}

</mosaic_0001>

<bundles_post_ra>
// kernel: tpu_custom_call.1
= control target key start
LH: loop header
LB: loop body
LE: loop exit
PB: predicated region body
PF: predicated region fallthrough
CT: control target
= control target key end

     0   :  { %s1177_s24 = smov 0   ;;  %s1333_s0 = inlined_call_operand.vmem [shape: bf16[256,16], index: 0, kind: input, shape index: {}]   ;;  %s1334_s1 = inlined_call_operand.vmem [shape: bf16[16,32], index: 1, kind: input, shape index: {}]   ;;  %s1335_s2 = inlined_call_operand.vmem [shape: f32[1,32], index: 2, kind: input, shape index: {}]   ;;  %s1336_s3 = inlined_call_operand.vmem [shape: bf16[32,32], index: 3, kind: input, shape index: {}]   ;;  %s1337_s4 = inlined_call_operand.vmem [shape: f32[1,32], index: 4, kind: input, shape index: {}]   ;;  %s1338_s5 = inlined_call_operand.vmem [shape: bf16[32,32], index: 5, kind: input, shape index: {}]   ;;  %s1339_s6 = inlined_call_operand.vmem [shape: f32[1,32], index: 6, kind: input, shape index: {}]   ;;  %s1340_s7 = inlined_call_operand.vmem [shape: f32[256,32], index: 7, kind: output, shape index: {}]  }
   0x1 LB: > { %s936_s25 = sadd.s32 4294967295, %s1135_s24   ;;  %p940_p0 = scmp.ge.s32.totalorder %s1135_s24, 1  ;;  %s1135_s24 = sphi %s1177_s24, %s17_s24  }
   0x2   : > { %p238_p1 = scmp.lt.s32.totalorder %s1135_s24, 3 }
   0x4   : > { %p239_p2 = pnand %p940_p0, %p238_p1 }
   0x5   : > { %v1084_v0 = vld [vmem:[%s1334_s1] sm:$0xff] (!%p239_p2)   ;;  %s941_s28 = sshll.u32 (!%p239_p2), %s936_s25, 4  ;;  %vm354_vm0 = vcmask (!%p239_p2), 130048   ;;  %v1094_v10 = vld [vmem:[%s1336_s3 + $0x8] sm:$0xff] (!%p239_p2)   ;;  %vm523_vm1 = vcmask (!%p239_p2), 261120  }
   0x6   : > { %242 = sbr.rel (%p239_p2) target bundleno = 718 (0x2ce), region = 48  ;;  %p271_p3 = scmp.lt.s32.totalorder (!%p239_p2), %s941_s28, 31  ;;  %1016 = vmatprep.subr.bf16.mxu0 (!%p239_p2), %v1084_v0  ;;  %1074 = vmatprep.subr.bf16.mxu1 (!%p239_p2), %v1084_v0  ;;  %v1093_v1 = vld [vmem:[%s1336_s3] sm:$0xff] (!%p239_p2)  }
   0x7   : > { %1017 = vmatpush3.bf16.msra.mxu0 (!%p239_p2), %v1084_v0  ;;  %1075 = vmatpush3.bf16.msra.mxu1 (!%p239_p2), %v1084_v0  ;;  %v1095_v11 = vld [vmem:[%s1338_s5] sm:$0xff] (!%p239_p2)  }
   0x8   : > { %1034 = vmatprep.subr.bf16.mxu1 (!%p239_p2), %v1093_v1  ;;  %1054 = vmatprep.subr.bf16.mxu0 (!%p239_p2), %v1095_v11  ;;  %v945_v12 = vld [vmem:[%s1335_s2] ss:$0 sm:$0xff] (!%p239_p2) }
   0xd   : > { %s1342_s28 = smov (!%p271_p3, %s941_s28), 31 }
   0xe   : > { %s942_s8 = sshll.u32 %s1342_s28, 2  ;;  %s944_s25 = sshll.u32 %s1342_s28, 3 }
   0xf   : > { %s274_s11 = scalar_lea.vmem %s1333_s0, %s942_s8  ;;  %s1256_s29 = scalar_lea.vmem %s1340_s7, %s944_s25 }
  0x10   : > { %v1085_v2 = vld [vmem:[%s274_s11] sm:$0xff]   ;;  %v1086_v3 = vld [vmem:[%s274_s11 + $0x8] sm:$0xff]   ;;  %v1087_v4 = vld [vmem:[%s274_s11 + $0x10] sm:$0xff]  }
  0x11   : > { %1018 = vmatprep.mubr.msk.bf16.mxu0 %vm354_vm0, %v1085_v2  ;;  %v1089_v5 = vld [vmem:[%s274_s11 + $0x20] sm:$0xff]   ;;  %v1090_v6 = vld [vmem:[%s274_s11 + $0x28] sm:$0xff]   ;;  %v1091_v7 = vld [vmem:[%s274_s11 + $0x30] sm:$0xff]  }
  0x12   : > { %1019 = vmatmul.mubr.msk.bf16.vlgmr.msra.gmra.mrb[0].mxu0 %vm354_vm0, %v1086_v3  ;;  %1026 = vmatprep.mubr.msk.bf16.mxu1 %vm354_vm0, %v1089_v5  ;;  %v1088_v8 = vld [vmem:[%s274_s11 + $0x18] sm:$0xff]   ;;  %v1096_v5 = vld [vmem:[%s1338_s5 + $0x8] sm:$0xff]  }
  0x13   : > { %1022 = vmatprep.mubr.msk.bf16.mxu0 %vm354_vm0, %v1087_v4  ;;  %1027 = vmatmul.mubr.msk.bf16.vlgmr.msra.gmra.mrb[0].mxu1 %vm354_vm0, %v1090_v6  ;;  %v1092_v9 = vld [vmem:[%s274_s11 + $0x38] sm:$0xff]   ;;  %v963_v6 = vld [vmem:[%s1337_s4] ss:$0 sm:$0xff] }
  0x14   : > { %1030 = vmatprep.mubr.msk.bf16.mxu1 %vm354_vm0, %v1091_v7  ;;  %1035 = vmatpush3.bf16.msra.mxu1 %v1093_v1 }
  0x15   : > { %1036 = vmatprep.subr.bf16.mxu1 %v1094_v10  ;;  %1055 = vmatpush3.bf16.msra.mxu0 %v1095_v11 }
  0x16   : > { %1056 = vmatprep.subr.bf16.mxu0 %v1096_v5 }
  0x18   : > { %1037 = vmatpush3.bf16.msra.mxu1 %v1094_v10 }
  0x19   : > { %1057 = vmatpush3.bf16.msra.mxu0 %v1096_v5 }
  0x1a   : > { %1023 = vmatmul.mubr.msk.bf16.gmra.mrb[4].mxu0 %vm354_vm0, %v1088_v8 }
  0x1b   : > { %1031 = vmatmul.mubr.msk.bf16.gmra.mrb[4].mxu1 %vm354_vm0, %v1092_v9 }
  0xe5   : > { %v1020_v13 = vpop.f32.mrb[0].mxu0 }
  0xe6   : > { %v422_v14 = vadd.f32 %v1020_v13, %v945_v12  ;;  %v413_v15 = vpop.f32.mrb[1].mxu0  ;;  %v1028_v21 = vpop.f32.mrb[0].mxu1 }
  0xe7   : > { %v414_v16 = vadd.f32 %v945_v12, %v413_v15  ;;  %v1021_v17 = vpop.f32.mrb[2].mxu0  ;;  %v454_v24 = vadd.f32 %v1028_v21, %v945_v12  ;;  %v445_v25 = vpop.f32.mrb[1].mxu1 }
  0xe8   : > { %v425_v18 = vadd.f32 %v1021_v17, %v945_v12  ;;  %v416_v19 = vpop.f32.mrb[3].mxu0  ;;  %v478_v22 = vmax.f32 %v422_v14, 0.0  ;;  %v446_v28 = vadd.f32 %v945_v12, %v445_v25  ;;  %v1029_v29 = vpop.f32.mrb[2].mxu1 }
  0xe9   : > { %v417_v20 = vadd.f32 %v945_v12, %v416_v19  ;;  %v476_v26 = vmax.f32 %v414_v16, 0.0  ;;  %v486_v31 = vmax.f32 %v454_v24, 0.0  ;;  %v457_v32 = vadd.f32 %v1029_v29, %v945_v12  ;;  %v448_v33 = vpop.f32.mrb[3].mxu1 }
  0xea   : > { %v479_v23 = vmax.f32 %v425_v18, 0.0  ;;  %v484_v36 = vmax.f32 %v446_v28, 0.0  ;;  %v449_v37 = vadd.f32 %v945_v12, %v448_v33 }
  0xeb   : > { %v477_v27 = vmax.f32 %v417_v20, 0.0  ;;  %v487_v40 = vmax.f32 %v457_v32, 0.0 }
  0xec   : > { %v493_v30 = vpack.c.bf16 %v479_v23, %v478_v22  ;;  %v485_v43 = vmax.f32 %v449_v37, 0.0 }
  0xed   : > { %v492_v34 = vpack.c.bf16 %v477_v27, %v476_v26  ;;  %v1024_v35 = vpop.f32.mrb[4].mxu0  ;;  %v497_v46 = vpack.c.bf16 %v487_v40, %v486_v31 }
  0xee   : > { %v438_v38 = vadd.f32 %v1024_v35, %v945_v12  ;;  %v429_v39 = vpop.f32.mrb[5].mxu0  ;;  %v496_v48 = vpack.c.bf16 %v485_v43, %v484_v36  ;;  %v1032_v49 = vpop.f32.mrb[4].mxu1 }
  0xef   : > { %v430_v41 = vadd.f32 %v945_v12, %v429_v39  ;;  %v1025_v42 = vpop.f32.mrb[6].mxu0  ;;  %1038 = vmatprep.mubr.msk.bf16.mxu1 %vm523_vm1, %v492_v34  ;;  %v470_v52 = vadd.f32 %v1032_v49, %v945_v12  ;;  %v461_v53 = vpop.f32.mrb[5].mxu1 }
  0xf0   : > { %v441_v44 = vadd.f32 %v1025_v42, %v945_v12  ;;  %v432_v45 = vpop.f32.mrb[7].mxu0  ;;  %1039 = vmatmul.mubr.msk.bf16.vlgmr.msra.gmra.mrb[8].mxu1 %vm523_vm1, %v493_v30  ;;  %v482_v50 = vmax.f32 %v438_v38, 0.0  ;;  %v462_v56 = vadd.f32 %v945_v12, %v461_v53  ;;  %v1033_v57 = vpop.f32.mrb[6].mxu1 }
  0xf1   : > { %v433_v47 = vadd.f32 %v945_v12, %v432_v45  ;;  %v480_v54 = vmax.f32 %v430_v41, 0.0  ;;  %v490_v59 = vmax.f32 %v470_v52, 0.0  ;;  %v473_v60 = vadd.f32 %v1033_v57, %v945_v12  ;;  %v464_v61 = vpop.f32.mrb[7].mxu1 }
  0xf2   : > { %v483_v51 = vmax.f32 %v441_v44, 0.0  ;;  %v488_v63 = vmax.f32 %v462_v56, 0.0  ;;  %v465_v0 = vadd.f32 %v945_v12, %v464_v61 }
  0xf3   : > { %v481_v55 = vmax.f32 %v433_v47, 0.0  ;;  %v491_v1 = vmax.f32 %v473_v60, 0.0 }
  0xf4   : > { %v495_v58 = vpack.c.bf16 %v483_v51, %v482_v50  ;;  %v489_v2 = vmax.f32 %v465_v0, 0.0 }
  0xf5   : > { %v494_v62 = vpack.c.bf16 %v481_v55, %v480_v54  ;;  %v499_v3 = vpack.c.bf16 %v491_v1, %v490_v59 }
  0xf6   : > { %v498_v4 = vpack.c.bf16 %v489_v2, %v488_v63  ;;  %v1239_v63 = vld [vmem:[%s1339_s6] ss:$0 sm:$0xff] }
  0xf7   : > { %1042 = vmatprep.mubr.msk.bf16.mxu1 %vm523_vm1, %v494_v62 }
  0xf8   : > { %1043 = vmatmul.mubr.msk.bf16.gmra.mrb[12].mxu1 %vm523_vm1, %v495_v58 }
  0xf9   : > { %1046 = vmatprep.mubr.msk.bf16.mxu1 %vm523_vm1, %v496_v48 }
 0x100   : > { %1047 = vmatmul.mubr.msk.bf16.gmra.mrb[16].mxu1 %vm523_vm1, %v497_v46 }
 0x101   : > { %1050 = vmatprep.mubr.msk.bf16.mxu1 %vm523_vm1, %v498_v4 }
 0x108   : > { %1051 = vmatmul.mubr.msk.bf16.gmra.mrb[20].mxu1 %vm523_vm1, %v499_v3 }
 0x1c3   : > { %v1040_v7 = vpop.f32.mrb[8].mxu1 }
 0x1c4   : > { %v591_v8 = vadd.f32 %v1040_v7, %v963_v6  ;;  %v582_v9 = vpop.f32.mrb[9].mxu1 }
 0x1c5   : > { %v583_v10 = vadd.f32 %v963_v6, %v582_v9  ;;  %v1041_v11 = vpop.f32.mrb[10].mxu1 }
 0x1c6   : > { %v594_v12 = vadd.f32 %v1041_v11, %v963_v6  ;;  %v585_v13 = vpop.f32.mrb[11].mxu1  ;;  %v647_v15 = vmax.f32 %v591_v8, 0.0 }
 0x1c7   : > { %v586_v14 = vadd.f32 %v963_v6, %v585_v13  ;;  %v645_v17 = vmax.f32 %v583_v10, 0.0  ;;  %v813_v10 = vlaneseq }
 0x1c8   : > { %v648_v16 = vmax.f32 %v594_v12, 0.0 }
 0x1c9   : > { %v646_v18 = vmax.f32 %v586_v14, 0.0  ;;  %v1245_v14 = vand.u32 127, %v813_v10 }
 0x1ca   : > { %v662_v19 = vpack.c.bf16 %v648_v16, %v647_v15 }
 0x1cb   : > { %v661_v20 = vpack.c.bf16 %v646_v18, %v645_v17  ;;  %v1044_v21 = vpop.f32.mrb[12].mxu1  ;;  %vm815_vm2 = vcmp.lt.s32.totalorder %v1245_v14, 16 }
 0x1cc   : > { %v607_v22 = vadd.f32 %v1044_v21, %v963_v6  ;;  %v598_v23 = vpop.f32.mrb[13].mxu1 }
 0x1cd   : > { %v599_v24 = vadd.f32 %v963_v6, %v598_v23  ;;  %v1045_v25 = vpop.f32.mrb[14].mxu1  ;;  %1058 = vmatprep.mubr.msk.bf16.mxu0 %vm523_vm1, %v661_v20 }
 0x1ce   : > { %v610_v26 = vadd.f32 %v1045_v25, %v963_v6  ;;  %v601_v27 = vpop.f32.mrb[15].mxu1  ;;  %1059 = vmatmul.mubr.msk.bf16.vlgmr.msra.gmra.mrb[8].mxu0 %vm523_vm1, %v662_v19  ;;  %v651_v29 = vmax.f32 %v607_v22, 0.0 }
 0x1cf   : > { %v602_v28 = vadd.f32 %v963_v6, %v601_v27  ;;  %v649_v31 = vmax.f32 %v599_v24, 0.0 }
 0x1d0   : > { %v652_v30 = vmax.f32 %v610_v26, 0.0 }
 0x1d1   : > { %v650_v32 = vmax.f32 %v602_v28, 0.0 }
 0x1d2   : > { %v664_v33 = vpack.c.bf16 %v652_v30, %v651_v29 }
 0x1d3   : > { %v663_v34 = vpack.c.bf16 %v650_v32, %v649_v31  ;;  %v1048_v35 = vpop.f32.mrb[16].mxu1 }
 0x1d4   : > { %v623_v36 = vadd.f32 %v1048_v35, %v963_v6  ;;  %v614_v37 = vpop.f32.mrb[17].mxu1 }
 0x1d5   : > { %v615_v38 = vadd.f32 %v963_v6, %v614_v37  ;;  %v1049_v39 = vpop.f32.mrb[18].mxu1  ;;  %1062 = vmatprep.mubr.msk.bf16.mxu0 %vm523_vm1, %v663_v34 }
 0x1d6   : > { %v626_v40 = vadd.f32 %v1049_v39, %v963_v6  ;;  %v617_v41 = vpop.f32.mrb[19].mxu1  ;;  %1063 = vmatmul.mubr.msk.bf16.gmra.mrb[12].mxu0 %vm523_vm1, %v664_v33  ;;  %v655_v43 = vmax.f32 %v623_v36, 0.0 }
 0x1d7   : > { %v618_v42 = vadd.f32 %v963_v6, %v617_v41  ;;  %v653_v45 = vmax.f32 %v615_v38, 0.0 }
 0x1d8   : > { %v656_v44 = vmax.f32 %v626_v40, 0.0 }
 0x1d9   : > { %v654_v46 = vmax.f32 %v618_v42, 0.0 }
 0x1da   : > { %v666_v47 = vpack.c.bf16 %v656_v44, %v655_v43 }
 0x1db   : > { %v665_v48 = vpack.c.bf16 %v654_v46, %v653_v45  ;;  %v1052_v49 = vpop.f32.mrb[20].mxu1 }
 0x1dc   : > { %v639_v50 = vadd.f32 %v1052_v49, %v963_v6  ;;  %v630_v51 = vpop.f32.mrb[21].mxu1 }
 0x1dd   : > { %v631_v52 = vadd.f32 %v963_v6, %v630_v51  ;;  %v1053_v53 = vpop.f32.mrb[22].mxu1  ;;  %1066 = vmatprep.mubr.msk.bf16.mxu0 %vm523_vm1, %v665_v48 }
 0x1de   : > { %v642_v54 = vadd.f32 %v1053_v53, %v963_v6  ;;  %v633_v55 = vpop.f32.mrb[23].mxu1  ;;  %1067 = vmatmul.mubr.msk.bf16.gmra.mrb[16].mxu0 %vm523_vm1, %v666_v47  ;;  %v659_v57 = vmax.f32 %v639_v50, 0.0 }
 0x1df   : > { %v634_v56 = vadd.f32 %v963_v6, %v633_v55  ;;  %v657_v59 = vmax.f32 %v631_v52, 0.0 }
 0x1e0   : > { %v660_v58 = vmax.f32 %v642_v54, 0.0 }
 0x1e1   : > { %v658_v60 = vmax.f32 %v634_v56, 0.0 }
 0x1e2   : > { %v668_v61 = vpack.c.bf16 %v660_v58, %v659_v57 }
 0x1e3   : > { %v667_v62 = vpack.c.bf16 %v658_v60, %v657_v59 }
 0x1e5   : > { %1070 = vmatprep.mubr.msk.bf16.mxu0 %vm523_vm1, %v667_v62 }
 0x1e6   : > { %1071 = vmatmul.mubr.msk.bf16.gmra.mrb[20].mxu0 %vm523_vm1, %v668_v61 }
 0x2a1   : > { %v1060_v0 = vpop.f32.mrb[8].mxu0 }
 0x2a2   : > { %v759_v1 = vadd.f32 %v1060_v0, %v1239_v63  ;;  %v750_v2 = vpop.f32.mrb[9].mxu0 }
 0x2a3   : > { %v751_v3 = vadd.f32 %v1239_v63, %v750_v2  ;;  %v1061_v4 = vpop.f32.mrb[10].mxu0 }
 0x2a4   : > { %v820_v5 = vmul.f32 1.442695, %v759_v1  ;;  %v762_v6 = vadd.f32 %v1061_v4, %v1239_v63  ;;  %v753_v7 = vpop.f32.mrb[11].mxu0 }
 0x2a5   : > { %v816_v8 = vmul.f32 1.442695, %v751_v3  ;;  %v754_v9 = vadd.f32 %v1239_v63, %v753_v7 }
 0x2a6   : > { %1097 = vpow2.f32 %v820_v5  ;;  %v822_v11 = vmul.f32 1.442695, %v762_v6 }
 0x2a7   : > { %1099 = vpow2.f32 %v816_v8  ;;  %v818_v12 = vmul.f32 1.442695, %v754_v9 }
 0x2a8   : > { %1101 = vpow2.f32 %v822_v11 }
 0x2a9   : > { %1103 = vpow2.f32 %v818_v12  ;;  %v1064_v13 = vpop.f32.mrb[12].mxu0 }
 0x2aa   : > { %v775_v15 = vadd.f32 %v1064_v13, %v1239_v63  ;;  %v766_v16 = vpop.f32.mrb[13].mxu0 }
 0x2ab   : > { %v767_v17 = vadd.f32 %v1239_v63, %v766_v16  ;;  %v1065_v18 = vpop.f32.mrb[14].mxu0 }
 0x2ac   : > { %v828_v19 = vmul.f32 1.442695, %v775_v15  ;;  %v778_v20 = vadd.f32 %v1065_v18, %v1239_v63  ;;  %v769_v21 = vpop.f32.mrb[15].mxu0 }
 0x2ad   : > { %v824_v22 = vmul.f32 1.442695, %v767_v17  ;;  %v770_v23 = vadd.f32 %v1239_v63, %v769_v21 }
 0x2ae   : > { %1105 = vpow2.f32 %v828_v19  ;;  %v830_v24 = vmul.f32 1.442695, %v778_v20 }
 0x2af   : > { %1107 = vpow2.f32 %v824_v22  ;;  %v826_v25 = vmul.f32 1.442695, %v770_v23 }
 0x2b0   : > { %v1098_v26 = vpop.eup %1097  ;;  %1109 = vpow2.f32 %v830_v24 }
 0x2b1   : > { %v1100_v27 = vpop.eup %1099  ;;  %v850_v28 = vsel %vm815_vm2, %v759_v1, %v1098_v26  ;;  %1111 = vpow2.f32 %v826_v25  ;;  %v1068_v29 = vpop.f32.mrb[16].mxu0 }
 0x2b2   : > { %v1102_v30 = vpop.eup %1101  ;;  %866 = vst.msk [vmem:[%s1256_s29 + $0x10] sm:$0xff] %vm523_vm1, %v850_v28  ;;  %v848_v31 = vsel %vm815_vm2, %v751_v3, %v1100_v27  ;;  %v791_v32 = vadd.f32 %v1068_v29, %v1239_v63  ;;  %v782_v33 = vpop.f32.mrb[17].mxu0 }
 0x2b3   : > { %v1104_v34 = vpop.eup %1103  ;;  %864 = vst.msk [vmem:[%s1256_s29] sm:$0xff] %vm523_vm1, %v848_v31  ;;  %v851_v35 = vsel %vm815_vm2, %v762_v6, %v1102_v30  ;;  %v783_v36 = vadd.f32 %v1239_v63, %v782_v33  ;;  %v1069_v37 = vpop.f32.mrb[18].mxu0 }
 0x2b4   : > { %867 = vst.msk [vmem:[%s1256_s29 + $0x18] sm:$0xff] %vm523_vm1, %v851_v35  ;;  %v849_v38 = vsel %vm815_vm2, %v754_v9, %v1104_v34  ;;  %v836_v39 = vmul.f32 1.442695, %v791_v32  ;;  %v794_v40 = vadd.f32 %v1069_v37, %v1239_v63  ;;  %v785_v41 = vpop.f32.mrb[19].mxu0 }
 0x2b5   : > { %865 = vst.msk [vmem:[%s1256_s29 + $0x8] sm:$0xff] %vm523_vm1, %v849_v38  ;;  %v832_v42 = vmul.f32 1.442695, %v783_v36  ;;  %v786_v43 = vadd.f32 %v1239_v63, %v785_v41 }
 0x2b6   : > { %1113 = vpow2.f32 %v836_v39  ;;  %v838_v44 = vmul.f32 1.442695, %v794_v40 }
 0x2b7   : > { %1115 = vpow2.f32 %v832_v42  ;;  %v834_v45 = vmul.f32 1.442695, %v786_v43 }
 0x2b8   : > { %v1106_v46 = vpop.eup %1105  ;;  %1117 = vpow2.f32 %v838_v44 }
 0x2b9   : > { %v1108_v47 = vpop.eup %1107  ;;  %v854_v48 = vsel %vm815_vm2, %v775_v15, %v1106_v46  ;;  %1119 = vpow2.f32 %v834_v45  ;;  %v1072_v49 = vpop.f32.mrb[20].mxu0 }
 0x2ba   : > { %v1110_v50 = vpop.eup %1109  ;;  %870 = vst.msk [vmem:[%s1256_s29 + $0x30] sm:$0xff] %vm523_vm1, %v854_v48  ;;  %v852_v51 = vsel %vm815_vm2, %v767_v17, %v1108_v47  ;;  %v807_v52 = vadd.f32 %v1072_v49, %v1239_v63  ;;  %v798_v53 = vpop.f32.mrb[21].mxu0 }
 0x2bb   : > { %v1112_v54 = vpop.eup %1111  ;;  %868 = vst.msk [vmem:[%s1256_s29 + $0x20] sm:$0xff] %vm523_vm1, %v852_v51  ;;  %v855_v55 = vsel %vm815_vm2, %v778_v20, %v1110_v50  ;;  %v799_v56 = vadd.f32 %v1239_v63, %v798_v53  ;;  %v1073_v57 = vpop.f32.mrb[22].mxu0 }
 0x2bc   : > { %871 = vst.msk [vmem:[%s1256_s29 + $0x38] sm:$0xff] %vm523_vm1, %v855_v55  ;;  %v853_v58 = vsel %vm815_vm2, %v770_v23, %v1112_v54  ;;  %v844_v59 = vmul.f32 1.442695, %v807_v52  ;;  %v810_v60 = vadd.f32 %v1073_v57, %v1239_v63  ;;  %v801_v61 = vpop.f32.mrb[23].mxu0 }
 0x2bd   : > { %869 = vst.msk [vmem:[%s1256_s29 + $0x28] sm:$0xff] %vm523_vm1, %v853_v58  ;;  %v840_v62 = vmul.f32 1.442695, %v799_v56  ;;  %v802_v0 = vadd.f32 %v1239_v63, %v801_v61 }
 0x2be   : > { %1121 = vpow2.f32 %v844_v59  ;;  %v846_v1 = vmul.f32 1.442695, %v810_v60 }
 0x2bf   : > { %1123 = vpow2.f32 %v840_v62  ;;  %v842_v2 = vmul.f32 1.442695, %v802_v0 }
 0x2c0   : > { %v1114_v3 = vpop.eup %1113  ;;  %1125 = vpow2.f32 %v846_v1 }
 0x2c1   : > { %v1116_v4 = vpop.eup %1115  ;;  %v858_v5 = vsel %vm815_vm2, %v791_v32, %v1114_v3  ;;  %1127 = vpow2.f32 %v842_v2 }
 0x2c2   : > { %v1118_v6 = vpop.eup %1117  ;;  %874 = vst.msk [vmem:[%s1256_s29 + $0x50] sm:$0xff] %vm523_vm1, %v858_v5  ;;  %v856_v63 = vsel %vm815_vm2, %v783_v36, %v1116_v4 }
 0x2c3   : > { %v1120_v7 = vpop.eup %1119  ;;  %872 = vst.msk [vmem:[%s1256_s29 + $0x40] sm:$0xff] %vm523_vm1, %v856_v63  ;;  %v859_v8 = vsel %vm815_vm2, %v794_v40, %v1118_v6 }
 0x2c4   : > { %875 = vst.msk [vmem:[%s1256_s29 + $0x58] sm:$0xff] %vm523_vm1, %v859_v8  ;;  %v857_v9 = vsel %vm815_vm2, %v786_v43, %v1120_v7 }
 0x2c5   : > { %873 = vst.msk [vmem:[%s1256_s29 + $0x48] sm:$0xff] %vm523_vm1, %v857_v9 }
 0x2c8   : > { %v1122_v10 = vpop.eup %1121 }
 0x2c9   : > { %v1124_v11 = vpop.eup %1123  ;;  %v862_v12 = vsel %vm815_vm2, %v807_v52, %v1122_v10 }
 0x2ca   : > { %v1126_v13 = vpop.eup %1125  ;;  %878 = vst.msk [vmem:[%s1256_s29 + $0x70] sm:$0xff] %vm523_vm1, %v862_v12  ;;  %v860_v15 = vsel %vm815_vm2, %v799_v56, %v1124_v11 }
 0x2cb   : > { %v1128_v16 = vpop.eup %1127  ;;  %876 = vst.msk [vmem:[%s1256_s29 + $0x60] sm:$0xff] %vm523_vm1, %v860_v15  ;;  %v863_v17 = vsel %vm815_vm2, %v810_v60, %v1126_v13 }
 0x2cc   : > { %879 = vst.msk [vmem:[%s1256_s29 + $0x78] sm:$0xff] %vm523_vm1, %v863_v17  ;;  %v861_v18 = vsel %vm815_vm2, %v802_v0, %v1128_v16 }
 0x2cd   : > { %877 = vst.msk [vmem:[%s1256_s29 + $0x68] sm:$0xff] %vm523_vm1, %v861_v18 }
 0x2ce PF: > { %s17_s24 = sadd.s32 1, %s1135_s24  }
 0x2cf   : > { %p14_p4 = scmp.ge.s32.totalorder %s17_s24, 4  }
 0x2d1   :  { %16 = sbr.rel (!%p14_p4) target bundleno = 1 (0x1), region = 78 }

</bundles_post_ra>
